<compile_context>
chip_gen: v6e
topology: v6e:2x2x1
jax: 0.10.0
libtpu: 0.0.40
codegen_flags: <defaults>
</compile_context>

<pallas_src>
import jax
import jax.numpy as jnp
from jax.experimental import pallas as pl
from jax.experimental.pallas import tpu as pltpu


def _fusion_loss_kernel(y_ref, ir_ref, gen_ref, part_ref):
    # Input blocks: (1, 1, H, W); output block: (1, 8, 128) partial sums.
    _, _, H, W = y_ref.shape

    # Per-tile upcast (no-op for f32 inputs); accumulation is always f32.
    y = y_ref[0, 0].astype(jnp.float32)      # (H, W)
    ir = ir_ref[0, 0].astype(jnp.float32)
    gen = gen_ref[0, 0].astype(jnp.float32)

    # --- hoisted boundary masks, shared by all three sobel() calls ----------
    col = jax.lax.broadcasted_iota(jnp.int32, (H, W), 1)
    row = jax.lax.broadcasted_iota(jnp.int32, (H, W), 0)
    has_left = col > 0            # j-1 exists
    has_right = col < (W - 1)     # j+1 exists
    has_up = row > 0              # i-1 exists
    has_down = row < (H - 1)      # i+1 exists
    zero = jnp.zeros((), jnp.float32)

    # Aligned-shape shifted neighbors: circular XLU rotate + mask off the
    # wrapped column/row (zero conv halo), never leaving the (H, W) tiling.
    def left_nbr(x):     # x[i, j-1], zero outside
        return jnp.where(has_left, pltpu.roll(x, 1, 1), zero)

    def right_nbr(x):    # x[i, j+1], zero outside
        return jnp.where(has_right, pltpu.roll(x, W - 1, 1), zero)

    def up_nbr(x):       # x[i-1, j], zero outside
        return jnp.where(has_up, pltpu.roll(x, 1, 0), zero)

    def down_nbr(x):     # x[i+1, j], zero outside
        return jnp.where(has_down, pltpu.roll(x, H - 1, 0), zero)

    def sobel(x):
        # Separable row stencils:
        #   s = x[.,j+1] - x[.,j-1]            (difference)
        #   t = x[.,j-1] + 2 x + x[.,j+1]      (smoothing)
        #   gx = s(up) + 2 s + s(down)         (Sobel-x)
        #   gy = t(up) - t(down)               (Sobel-y)
        l = left_nbr(x)
        r = right_nbr(x)
        s = r - l
        t = l + 2.0 * x + r
        gx = up_nbr(s) + 2.0 * s + down_nbr(s)
        gy = up_nbr(t) - down_nbr(t)
        return jnp.abs(gx) + jnp.abs(gy)

    # Intensity L1 partial sum (smallest live set first). One reduce.
    s_in = jnp.sum(jnp.abs(jnp.maximum(y, ir) - gen))

    # Gradient L1 partial sum: fold max(sobel(y), sobel(ir)) before computing
    # sobel(gen) to keep live ranges short. One reduce.
    joint_grad = jnp.maximum(sobel(y), sobel(ir))
    s_grad = jnp.sum(jnp.abs(joint_grad - sobel(gen)))

    # Single lane-dense (8, 128) output tile per batch element:
    #   sublane 0 <- s_in, sublane 1 <- s_grad, rest zero. One unmasked vst.
    out_row = jax.lax.broadcasted_iota(jnp.int32, (8, 128), 0)
    tile = jnp.where(out_row == 0, s_in,
                     jnp.where(out_row == 1, s_grad, jnp.float32(0.0)))
    part_ref[0] = tile


def _vmem_limit_bytes():
    """Generation-aware VMEM limit: ~52 MiB on v7x, ~112 MiB on v5e/v6e."""
    cap = None
    try:
        info = pltpu.get_tpu_info()
        cap = getattr(info, "vmem_capacity_bytes", None)
    except Exception:
        cap = None
    if cap is None:
        cap = 64 * 1024 * 1024  # conservative: v7x physical per-TC VMEM
    limit = cap - 12 * 1024 * 1024          # headroom for compiler scratch
    limit = max(limit, 32 * 1024 * 1024)
    limit = min(limit, 112 * 1024 * 1024)
    return int(limit)


def fusion_loss(image_vis, image_ir, generate_img):
    """image_vis: [B, C, H, W]; image_ir, generate_img: [B, 1, H, W] (NCHW).

    Returns (loss_total, loss_in, loss_grad) as f32 scalars, matching the
    PyTorch Fusionloss forward.
    """
    B, _, H, W = image_vis.shape

    # Block only channel 0 of each input directly from HBM (no wrapper copy).
    plane_spec = pl.BlockSpec((1, 1, H, W), lambda b: (b, 0, 0, 0))
    part_spec = pl.BlockSpec((1, 8, 128), lambda b: (b, 0, 0))

    itemsize = jnp.dtype(image_vis.dtype).itemsize
    cost = pl.CostEstimate(
        flops=60 * B * H * W,                                   # stencils + abs/max/L1
        transcendentals=0,
        bytes_accessed=3 * B * H * W * itemsize + B * 8 * 128 * 4,
    )

    parts = pl.pallas_call(
        _fusion_loss_kernel,
        grid=(B,),
        in_specs=[plane_spec, plane_spec, plane_spec],
        out_specs=part_spec,
        out_shape=jax.ShapeDtypeStruct((B, 8, 128), jnp.float32),
        compiler_params=pltpu.CompilerParams(
            dimension_semantics=("parallel",),   # stateless steps -> megacore OK
            vmem_limit_bytes=_vmem_limit_bytes(),
        ),
        cost_estimate=cost,
    )(image_vis, image_ir, generate_img)

    inv_n = 1.0 / float(B * H * W)
    loss_in = jnp.sum(parts[:, 0, 0]) * inv_n
    loss_grad = jnp.sum(parts[:, 1, 0]) * inv_n
    loss_total = loss_in + 10.0 * loss_grad
    return loss_total, loss_in, loss_grad


def _fusion_loss_ref(image_vis, image_ir, generate_img):
    """Pure-JAX reference matching the PyTorch module semantics."""
    y = image_vis[:, 0].astype(jnp.float32)
    ir = image_ir[:, 0].astype(jnp.float32)
    gen = generate_img[:, 0].astype(jnp.float32)

    kx = jnp.array([[-1., 0., 1.], [-2., 0., 2.], [-1., 0., 1.]], jnp.float32)
    ky = jnp.array([[1., 2., 1.], [0., 0., 0.], [-1., -2., -1.]], jnp.float32)

    def conv(x, w):
        x4 = x[:, None, :, :]
        w4 = w[None, None, :, :]
        return jax.lax.conv_general_dilated(
            x4, w4, window_strides=(1, 1), padding=((1, 1), (1, 1)),
            dimension_numbers=("NCHW", "OIHW", "NCHW"))[:, 0]

    def sobel(x):
        return jnp.abs(conv(x, kx)) + jnp.abs(conv(x, ky))

    loss_in = jnp.mean(jnp.abs(jnp.maximum(y, ir) - gen))
    loss_grad = jnp.mean(jnp.abs(jnp.maximum(sobel(y), sobel(ir)) - sobel(gen)))
    return loss_in + 10.0 * loss_grad, loss_in, loss_grad


if __name__ == "__main__":
    key = jax.random.PRNGKey(0)
    k1, k2, k3 = jax.random.split(key, 3)
    B, H, W = 2, 16, 16
    image_vis = jax.random.uniform(k1, (B, 3, H, W), jnp.float32)      # RGB visible image
    image_ir = jax.random.uniform(k2, (B, 1, H, W), jnp.float32)       # IR image
    generate_img = jax.random.uniform(k3, (B, 1, H, W), jnp.float32)   # fused image

    loss_total, loss_in, loss_grad = fusion_loss(image_vis, image_ir, generate_img)
    jax.block_until_ready((loss_total, loss_in, loss_grad))

    rt, ri, rg = _fusion_loss_ref(image_vis, image_ir, generate_img)
    assert jnp.allclose(loss_total, rt, rtol=1e-5, atol=1e-5), (loss_total, rt)
    assert jnp.allclose(loss_in, ri, rtol=1e-5, atol=1e-5), (loss_in, ri)
    assert jnp.allclose(loss_grad, rg, rtol=1e-5, atol=1e-5), (loss_grad, rg)

    print("KERNEL_OK")
</pallas_src>

<mosaic_0001>
module attributes {stable_mosaic.version = 11 : i64} {
  func.func @_fusion_loss_kernel(%arg0: i32, %arg1: memref<1x1x16x16xf32, #tpu.memory_space<vmem>>, %arg2: memref<1x1x16x16xf32, #tpu.memory_space<vmem>>, %arg3: memref<1x1x16x16xf32, #tpu.memory_space<vmem>>, %arg4: memref<1x8x128xf32, #tpu.memory_space<vmem>>) attributes {dimension_semantics = [#tpu.dimension_semantics<parallel>], iteration_bounds = array<i64: 2>, scalar_prefetch = 0 : i64, scratch_operands = 0 : i64, tpu.core_type = #tpu.core_type<tc>, window_params = [{transform_indices = @transform_0, window_bounds = array<i64: 1, 1, 16, 16>}, {transform_indices = @transform_1, window_bounds = array<i64: 1, 1, 16, 16>}, {transform_indices = @transform_2, window_bounds = array<i64: 1, 1, 16, 16>}, {transform_indices = @transform_3, window_bounds = array<i64: 1, 8, 128>}]} {
    %c0 = arith.constant 0 : index
    %c0_0 = arith.constant 0 : index
    %c0_1 = arith.constant 0 : index
    %c0_2 = arith.constant 0 : index
    %0 = vector.load %arg1[%c0, %c0_0, %c0_1, %c0_2] : memref<1x1x16x16xf32, #tpu.memory_space<vmem>>, vector<1x1x16x16xf32>
    %1 = vector.shape_cast %0 : vector<1x1x16x16xf32> to vector<16x16xf32>
    %c0_3 = arith.constant 0 : index
    %c0_4 = arith.constant 0 : index
    %c0_5 = arith.constant 0 : index
    %c0_6 = arith.constant 0 : index
    %2 = vector.load %arg2[%c0_3, %c0_4, %c0_5, %c0_6] : memref<1x1x16x16xf32, #tpu.memory_space<vmem>>, vector<1x1x16x16xf32>
    %3 = vector.shape_cast %2 : vector<1x1x16x16xf32> to vector<16x16xf32>
    %c0_7 = arith.constant 0 : index
    %c0_8 = arith.constant 0 : index
    %c0_9 = arith.constant 0 : index
    %c0_10 = arith.constant 0 : index
    %4 = vector.load %arg3[%c0_7, %c0_8, %c0_9, %c0_10] : memref<1x1x16x16xf32, #tpu.memory_space<vmem>>, vector<1x1x16x16xf32>
    %5 = vector.shape_cast %4 : vector<1x1x16x16xf32> to vector<16x16xf32>
    %6 = tpu.iota {dimensions = array<i32: 1>} : vector<16x16xi32>
    %7 = tpu.iota {dimensions = array<i32: 0>} : vector<16x16xi32>
    %c0_i32 = arith.constant 0 : i32
    %8 = vector.broadcast %c0_i32 : i32 to vector<16x16xi32>
    %9 = arith.cmpi sgt, %6, %8 : vector<16x16xi32>
    %c15_i32 = arith.constant 15 : i32
    %10 = vector.broadcast %c15_i32 : i32 to vector<16x16xi32>
    %11 = arith.cmpi slt, %6, %10 : vector<16x16xi32>
    %c0_i32_11 = arith.constant 0 : i32
    %12 = vector.broadcast %c0_i32_11 : i32 to vector<16x16xi32>
    %13 = arith.cmpi sgt, %7, %12 : vector<16x16xi32>
    %c15_i32_12 = arith.constant 15 : i32
    %14 = vector.broadcast %c15_i32_12 : i32 to vector<16x16xi32>
    %15 = arith.cmpi slt, %7, %14 : vector<16x16xi32>
    %16 = arith.maximumf %1, %3 : vector<16x16xf32>
    %17 = arith.subf %16, %5 : vector<16x16xf32>
    %18 = math.absf %17 : vector<16x16xf32>
    %19 = vector.shape_cast %18 : vector<16x16xf32> to vector<1x16x16xf32>
    %cst = arith.constant dense<0.000000e+00> : vector<1xf32>
    %20 = vector.multi_reduction <add>, %19, %cst [1, 2] : vector<1x16x16xf32> to vector<1xf32>
    %21 = vector.shape_cast %20 : vector<1xf32> to vector<1x1x1xf32>
    %22 = vector.extract %21[0, 0, 0] : f32 from vector<1x1x1xf32>
    %c1_i32 = arith.constant 1 : i32
    %23 = tpu.dynamic_rotate %1 by %c1_i32 dim 1 : vector<16x16xf32>, i32 -> vector<16x16xf32>
    %cst_13 = arith.constant 0.000000e+00 : f32
    %24 = vector.broadcast %cst_13 : f32 to vector<16x16xf32>
    %25 = arith.select %9, %23, %24 : vector<16x16xi1>, vector<16x16xf32>
    %c15_i32_14 = arith.constant 15 : i32
    %26 = tpu.dynamic_rotate %1 by %c15_i32_14 dim 1 : vector<16x16xf32>, i32 -> vector<16x16xf32>
    %cst_15 = arith.constant 0.000000e+00 : f32
    %27 = vector.broadcast %cst_15 : f32 to vector<16x16xf32>
    %28 = arith.select %11, %26, %27 : vector<16x16xi1>, vector<16x16xf32>
    %29 = arith.subf %28, %25 : vector<16x16xf32>
    %cst_16 = arith.constant 2.000000e+00 : f32
    %30 = vector.broadcast %cst_16 : f32 to vector<16x16xf32>
    %31 = arith.mulf %30, %1 : vector<16x16xf32>
    %32 = arith.addf %25, %31 : vector<16x16xf32>
    %33 = arith.addf %32, %28 : vector<16x16xf32>
    %c1_i32_17 = arith.constant 1 : i32
    %34 = tpu.dynamic_rotate %29 by %c1_i32_17 dim 0 : vector<16x16xf32>, i32 -> vector<16x16xf32>
    %cst_18 = arith.constant 0.000000e+00 : f32
    %35 = vector.broadcast %cst_18 : f32 to vector<16x16xf32>
    %36 = arith.select %13, %34, %35 : vector<16x16xi1>, vector<16x16xf32>
    %cst_19 = arith.constant 2.000000e+00 : f32
    %37 = vector.broadcast %cst_19 : f32 to vector<16x16xf32>
    %38 = arith.mulf %37, %29 : vector<16x16xf32>
    %39 = arith.addf %36, %38 : vector<16x16xf32>
    %c15_i32_20 = arith.constant 15 : i32
    %40 = tpu.dynamic_rotate %29 by %c15_i32_20 dim 0 : vector<16x16xf32>, i32 -> vector<16x16xf32>
    %cst_21 = arith.constant 0.000000e+00 : f32
    %41 = vector.broadcast %cst_21 : f32 to vector<16x16xf32>
    %42 = arith.select %15, %40, %41 : vector<16x16xi1>, vector<16x16xf32>
    %43 = arith.addf %39, %42 : vector<16x16xf32>
    %c1_i32_22 = arith.constant 1 : i32
    %44 = tpu.dynamic_rotate %33 by %c1_i32_22 dim 0 : vector<16x16xf32>, i32 -> vector<16x16xf32>
    %cst_23 = arith.constant 0.000000e+00 : f32
    %45 = vector.broadcast %cst_23 : f32 to vector<16x16xf32>
    %46 = arith.select %13, %44, %45 : vector<16x16xi1>, vector<16x16xf32>
    %c15_i32_24 = arith.constant 15 : i32
    %47 = tpu.dynamic_rotate %33 by %c15_i32_24 dim 0 : vector<16x16xf32>, i32 -> vector<16x16xf32>
    %cst_25 = arith.constant 0.000000e+00 : f32
    %48 = vector.broadcast %cst_25 : f32 to vector<16x16xf32>
    %49 = arith.select %15, %47, %48 : vector<16x16xi1>, vector<16x16xf32>
    %50 = arith.subf %46, %49 : vector<16x16xf32>
    %51 = math.absf %43 : vector<16x16xf32>
    %52 = math.absf %50 : vector<16x16xf32>
    %53 = arith.addf %51, %52 : vector<16x16xf32>
    %c1_i32_26 = arith.constant 1 : i32
    %54 = tpu.dynamic_rotate %3 by %c1_i32_26 dim 1 : vector<16x16xf32>, i32 -> vector<16x16xf32>
    %cst_27 = arith.constant 0.000000e+00 : f32
    %55 = vector.broadcast %cst_27 : f32 to vector<16x16xf32>
    %56 = arith.select %9, %54, %55 : vector<16x16xi1>, vector<16x16xf32>
    %c15_i32_28 = arith.constant 15 : i32
    %57 = tpu.dynamic_rotate %3 by %c15_i32_28 dim 1 : vector<16x16xf32>, i32 -> vector<16x16xf32>
    %cst_29 = arith.constant 0.000000e+00 : f32
    %58 = vector.broadcast %cst_29 : f32 to vector<16x16xf32>
    %59 = arith.select %11, %57, %58 : vector<16x16xi1>, vector<16x16xf32>
    %60 = arith.subf %59, %56 : vector<16x16xf32>
    %cst_30 = arith.constant 2.000000e+00 : f32
    %61 = vector.broadcast %cst_30 : f32 to vector<16x16xf32>
    %62 = arith.mulf %61, %3 : vector<16x16xf32>
    %63 = arith.addf %56, %62 : vector<16x16xf32>
    %64 = arith.addf %63, %59 : vector<16x16xf32>
    %c1_i32_31 = arith.constant 1 : i32
    %65 = tpu.dynamic_rotate %60 by %c1_i32_31 dim 0 : vector<16x16xf32>, i32 -> vector<16x16xf32>
    %cst_32 = arith.constant 0.000000e+00 : f32
    %66 = vector.broadcast %cst_32 : f32 to vector<16x16xf32>
    %67 = arith.select %13, %65, %66 : vector<16x16xi1>, vector<16x16xf32>
    %cst_33 = arith.constant 2.000000e+00 : f32
    %68 = vector.broadcast %cst_33 : f32 to vector<16x16xf32>
    %69 = arith.mulf %68, %60 : vector<16x16xf32>
    %70 = arith.addf %67, %69 : vector<16x16xf32>
    %c15_i32_34 = arith.constant 15 : i32
    %71 = tpu.dynamic_rotate %60 by %c15_i32_34 dim 0 : vector<16x16xf32>, i32 -> vector<16x16xf32>
    %cst_35 = arith.constant 0.000000e+00 : f32
    %72 = vector.broadcast %cst_35 : f32 to vector<16x16xf32>
    %73 = arith.select %15, %71, %72 : vector<16x16xi1>, vector<16x16xf32>
    %74 = arith.addf %70, %73 : vector<16x16xf32>
    %c1_i32_36 = arith.constant 1 : i32
    %75 = tpu.dynamic_rotate %64 by %c1_i32_36 dim 0 : vector<16x16xf32>, i32 -> vector<16x16xf32>
    %cst_37 = arith.constant 0.000000e+00 : f32
    %76 = vector.broadcast %cst_37 : f32 to vector<16x16xf32>
    %77 = arith.select %13, %75, %76 : vector<16x16xi1>, vector<16x16xf32>
    %c15_i32_38 = arith.constant 15 : i32
    %78 = tpu.dynamic_rotate %64 by %c15_i32_38 dim 0 : vector<16x16xf32>, i32 -> vector<16x16xf32>
    %cst_39 = arith.constant 0.000000e+00 : f32
    %79 = vector.broadcast %cst_39 : f32 to vector<16x16xf32>
    %80 = arith.select %15, %78, %79 : vector<16x16xi1>, vector<16x16xf32>
    %81 = arith.subf %77, %80 : vector<16x16xf32>
    %82 = math.absf %74 : vector<16x16xf32>
    %83 = math.absf %81 : vector<16x16xf32>
    %84 = arith.addf %82, %83 : vector<16x16xf32>
    %85 = arith.maximumf %53, %84 : vector<16x16xf32>
    %c1_i32_40 = arith.constant 1 : i32
    %86 = tpu.dynamic_rotate %5 by %c1_i32_40 dim 1 : vector<16x16xf32>, i32 -> vector<16x16xf32>
    %cst_41 = arith.constant 0.000000e+00 : f32
    %87 = vector.broadcast %cst_41 : f32 to vector<16x16xf32>
    %88 = arith.select %9, %86, %87 : vector<16x16xi1>, vector<16x16xf32>
    %c15_i32_42 = arith.constant 15 : i32
    %89 = tpu.dynamic_rotate %5 by %c15_i32_42 dim 1 : vector<16x16xf32>, i32 -> vector<16x16xf32>
    %cst_43 = arith.constant 0.000000e+00 : f32
    %90 = vector.broadcast %cst_43 : f32 to vector<16x16xf32>
    %91 = arith.select %11, %89, %90 : vector<16x16xi1>, vector<16x16xf32>
    %92 = arith.subf %91, %88 : vector<16x16xf32>
    %cst_44 = arith.constant 2.000000e+00 : f32
    %93 = vector.broadcast %cst_44 : f32 to vector<16x16xf32>
    %94 = arith.mulf %93, %5 : vector<16x16xf32>
    %95 = arith.addf %88, %94 : vector<16x16xf32>
    %96 = arith.addf %95, %91 : vector<16x16xf32>
    %c1_i32_45 = arith.constant 1 : i32
    %97 = tpu.dynamic_rotate %92 by %c1_i32_45 dim 0 : vector<16x16xf32>, i32 -> vector<16x16xf32>
    %cst_46 = arith.constant 0.000000e+00 : f32
    %98 = vector.broadcast %cst_46 : f32 to vector<16x16xf32>
    %99 = arith.select %13, %97, %98 : vector<16x16xi1>, vector<16x16xf32>
    %cst_47 = arith.constant 2.000000e+00 : f32
    %100 = vector.broadcast %cst_47 : f32 to vector<16x16xf32>
    %101 = arith.mulf %100, %92 : vector<16x16xf32>
    %102 = arith.addf %99, %101 : vector<16x16xf32>
    %c15_i32_48 = arith.constant 15 : i32
    %103 = tpu.dynamic_rotate %92 by %c15_i32_48 dim 0 : vector<16x16xf32>, i32 -> vector<16x16xf32>
    %cst_49 = arith.constant 0.000000e+00 : f32
    %104 = vector.broadcast %cst_49 : f32 to vector<16x16xf32>
    %105 = arith.select %15, %103, %104 : vector<16x16xi1>, vector<16x16xf32>
    %106 = arith.addf %102, %105 : vector<16x16xf32>
    %c1_i32_50 = arith.constant 1 : i32
    %107 = tpu.dynamic_rotate %96 by %c1_i32_50 dim 0 : vector<16x16xf32>, i32 -> vector<16x16xf32>
    %cst_51 = arith.constant 0.000000e+00 : f32
    %108 = vector.broadcast %cst_51 : f32 to vector<16x16xf32>
    %109 = arith.select %13, %107, %108 : vector<16x16xi1>, vector<16x16xf32>
    %c15_i32_52 = arith.constant 15 : i32
    %110 = tpu.dynamic_rotate %96 by %c15_i32_52 dim 0 : vector<16x16xf32>, i32 -> vector<16x16xf32>
    %cst_53 = arith.constant 0.000000e+00 : f32
    %111 = vector.broadcast %cst_53 : f32 to vector<16x16xf32>
    %112 = arith.select %15, %110, %111 : vector<16x16xi1>, vector<16x16xf32>
    %113 = arith.subf %109, %112 : vector<16x16xf32>
    %114 = math.absf %106 : vector<16x16xf32>
    %115 = math.absf %113 : vector<16x16xf32>
    %116 = arith.addf %114, %115 : vector<16x16xf32>
    %117 = arith.subf %85, %116 : vector<16x16xf32>
    %118 = math.absf %117 : vector<16x16xf32>
    %119 = vector.shape_cast %118 : vector<16x16xf32> to vector<1x16x16xf32>
    %cst_54 = arith.constant dense<0.000000e+00> : vector<1xf32>
    %120 = vector.multi_reduction <add>, %119, %cst_54 [1, 2] : vector<1x16x16xf32> to vector<1xf32>
    %121 = vector.shape_cast %120 : vector<1xf32> to vector<1x1x1xf32>
    %122 = vector.extract %121[0, 0, 0] : f32 from vector<1x1x1xf32>
    %123 = tpu.iota {dimensions = array<i32: 0>} : vector<8x128xi32>
    %c0_i32_55 = arith.constant 0 : i32
    %124 = vector.broadcast %c0_i32_55 : i32 to vector<8x128xi32>
    %125 = arith.cmpi eq, %123, %124 : vector<8x128xi32>
    %c1_i32_56 = arith.constant 1 : i32
    %126 = vector.broadcast %c1_i32_56 : i32 to vector<8x128xi32>
    %127 = arith.cmpi eq, %123, %126 : vector<8x128xi32>
    %cst_57 = arith.constant 0.000000e+00 : f32
    %128 = vector.broadcast %122 : f32 to vector<8x128xf32>
    %129 = vector.broadcast %cst_57 : f32 to vector<8x128xf32>
    %130 = arith.select %127, %128, %129 : vector<8x128xi1>, vector<8x128xf32>
    %131 = vector.broadcast %22 : f32 to vector<8x128xf32>
    %132 = arith.select %125, %131, %130 : vector<8x128xi1>, vector<8x128xf32>
    %c0_58 = arith.constant 0 : index
    %c0_59 = arith.constant 0 : index
    %c0_60 = arith.constant 0 : index
    %133 = vector.load %arg4[%c0_58, %c0_59, %c0_60] : memref<1x8x128xf32, #tpu.memory_space<vmem>>, vector<1x8x128xf32>
    %134 = vector.shape_cast %133 : vector<1x8x128xf32> to vector<8x128xf32>
    %135 = vector.shape_cast %132 : vector<8x128xf32> to vector<1x8x128xf32>
    tpu.vector_store %arg4[%c0_58, %c0_59, %c0_60], %135 {strides = array<i32>} : memref<1x8x128xf32, #tpu.memory_space<vmem>>, vector<1x8x128xf32>,
    return
  }
  func.func @transform_0(%arg0: i32) -> (i32, i32, i32, i32) {
    %c0_i32 = arith.constant 0 : i32
    %c0_i32_0 = arith.constant 0 : i32
    %c0_i32_1 = arith.constant 0 : i32
    %c0_i32_2 = arith.constant 0 : i32
    return %arg0, %c0_i32, %c0_i32_0, %c0_i32_1 : i32, i32, i32, i32
  }
  func.func @transform_1(%arg0: i32) -> (i32, i32, i32, i32) {
    %c0_i32 = arith.constant 0 : i32
    %c0_i32_0 = arith.constant 0 : i32
    %c0_i32_1 = arith.constant 0 : i32
    %c0_i32_2 = arith.constant 0 : i32
    return %arg0, %c0_i32, %c0_i32_0, %c0_i32_1 : i32, i32, i32, i32
  }
  func.func @transform_2(%arg0: i32) -> (i32, i32, i32, i32) {
    %c0_i32 = arith.constant 0 : i32
    %c0_i32_0 = arith.constant 0 : i32
    %c0_i32_1 = arith.constant 0 : i32
    %c0_i32_2 = arith.constant 0 : i32
    return %arg0, %c0_i32, %c0_i32_0, %c0_i32_1 : i32, i32, i32, i32
  }
  func.func @transform_3(%arg0: i32) -> (i32, i32, i32) {
    %c0_i32 = arith.constant 0 : i32
    %c0_i32_0 = arith.constant 0 : i32
    %c0_i32_1 = arith.constant 0 : i32
    return %arg0, %c0_i32, %c0_i32_0 : i32, i32, i32
  }
}

</mosaic_0001>

<bundles_post_ra>
// kernel: tpu_custom_call.1
= control target key start
LH: loop header
LB: loop body
LE: loop exit
PB: predicated region body
PF: predicated region fallthrough
CT: control target
= control target key end

     0   :  { %s1372_s0 = inlined_call_operand.hbm [shape: f32[2,3,16,16], index: 0, kind: input, shape index: {}]   ;;  %s1373_s1 = inlined_call_operand.hbm [shape: f32[2,1,16,16], index: 1, kind: input, shape index: {}]   ;;  %s1374_s2 = inlined_call_operand.hbm [shape: f32[2,1,16,16], index: 2, kind: input, shape index: {}]   ;;  %s1375_s3 = inlined_call_operand.hbm [shape: f32[2,8,128], index: 3, kind: output, shape index: {}]  }
   0x1   :  { %1382 = sst [smem:[#allocation12_spill]] %s1372_s0 }
   0x2   :  { %1383 = sst [smem:[#allocation13_spill]] %s1373_s1 }
   0x3   :  { %8 = vsyncpa [#allocation3], 0 }
   0x4   :  { %10 = vsyncpa [#allocation3 + $0x1], 0 }
   0x5   :  { %11 = vsyncpa [#allocation6], 0 }
   0x6   :  { %13 = vsyncpa [#allocation6 + $0x1], 0 }
   0x7   :  { %14 = vsyncpa [#allocation4], 0 }
   0x8   :  { %16 = vsyncpa [#allocation4 + $0x1], 0  ;;  %s956_s12 = smov 0   ;;  %s958_s13 = smov 0  }
   0x9   :  { %s960_s14 = smov 0   ;;  %s962_s15 = smov 0  }
   0xa LB: > { %s977_s16 = sadd.s32 4294967295, %s925_s15   ;;  %s685_s17 = sadd.s32 4294967294, %s925_s15   ;;  %s925_s15 = sphi %s962_s15, %s1402_s15   ;;  %s921_s14 = sphi %s960_s14, %s1401_s14   ;;  %s917_s13 = sphi %s958_s13, %s1400_s13   ;;  %s913_s12 = sphi %s956_s12, %s1399_s12  }
   0xb   : > { %s981_s18 = sadd.s32 1, %s925_s15   ;;  %s29_s19 = sadd.s32 1, %s921_s14 }
   0xc   : > { %s26_s20 = ssub.s32 %s925_s15, %s981_s18  ;;  %p36_p0 = scmp.ne.s32.totalorder %s921_s14, %s917_s13 }
   0xd   : > { %p27_p1 = scmp.eq.s32.totalorder %s26_s20, 0  ;;  %p37_p2 = scmp.eq.s32.totalorder %s925_s15, 0 }
   0xe   : > { %p42_p3 = scmp.ne.s32.totalorder %s917_s13, %s913_s12  ;;  %p43_p4 = scmp.eq.s32.totalorder %s977_s16, 0 }
   0xf   : > { %s993_s21 = scalar_select %p27_p1, %s921_s14, %s29_s19  }
  0x10   : > { %p38_p5 = por %p37_p2, %p36_p0  ;;  %p995_p6 = por %p43_p4, %p42_p3 }
  0x11   : > { %p118_p7 = scmp.eq.s32.totalorder %s977_s16, 1  ;;  %p124_p8 = scmp.eq.s32.totalorder %s685_s17, 1 }
  0x12   : > { %s1384_s22 = scalar_select %p995_p6, 1, 0 }
  0x13   : > { %p734_p10 = scmp.lt.s32.totalorder %s925_s15, 2  ;;  %p1002_p11 = por %p118_p7, %p36_p0 }
  0x14   : > { %p1006_p12 = por %p124_p8, %p42_p3  ;;  %s144_s25 = sand.u32 1, %s921_s14  }
  0x15   : > { %s1385_s23 = scalar_select %p1002_p11, 1, 0 }
  0x16   : > { %s1386_s24 = scalar_select %p1006_p12, 1, 0 }
  0x17   : > { %p1011_p13 = pnand %p734_p10, %p38_p5  ;;  %s1017_s27 = sshll.u32 %s144_s25, 4 }
  0x18   : > { %s165_s28 = sand.u32 1, %s925_s15   ;;  %s705_s29 = sshll.u32 %s925_s15, 8 }
  0x19   : > { %s1388_s1 = sld [smem:[#allocation13_spill]]  ;;  %s169_s6 = scalar_lea.vmem [#allocation5], %s1017_s27 }
  0x1a   : > { %s176_s7 = sshll.u32 %s169_s6, 4  ;;  %s1032_s10 = scalar_lea.hbm %s1374_s2, %s705_s29  ;;  %s1027_s7 = int_to_ptr.vmem [resolvable:$true] %s176_s7 }
  0x1b   : > { %s1034_s11 = scalar_lea.sflag [#allocation6], %s165_s28  ;;  %p1040_p1 = pneg %p1011_p13 }
  0x1f   : > { %s1024_s5 = scalar_lea.hbm %s1388_s1, %s705_s29  ;;  %s778_s4 = scalar_lea.hbm %s1388_s1, 512 }
  0x20   : > { %s773_s17 = scalar_lea.hbm %s1024_s5, 256  ;;  %p779_p4 = scmp.lt.s32.totalorder %s1024_s5, %s1388_s1 }
  0x21   : > { %p774_p0 = scmp.ne.s32.totalorder %s1024_s5, %s773_s17  ;;  %p780_p5 = scmp.lt.s32.totalorder %s778_s4, %s773_s17 }
  0x23   : > { %p776_p2 = pnand %p1040_p1, %p774_p0  ;;  %p781_p7 = por %p780_p5, %p779_p4 }
  0x25   : > { %p777_p3 = pneg %p776_p2 }
  0x27   : > { %p782_p8 = pnand %p781_p7, %p777_p3 }
  0x29   : > { %785 = shalt.err (!%p782_p8)
}
  0x2a   : > { %s786_s28 = scalar_lea.vmem %s1027_s7, 256  ;;  %s927_s8 = smov [#allocation5]  }
  0x2b   : > { %p787_p10 = scmp.ne.s32.totalorder %s1027_s7, %s786_s28  ;;  %s791_s9 = sshll.u32 %s927_s8, 4  ;;  %s792_s9 = int_to_ptr.vmem [resolvable:$false] %s791_s9 }
  0x2c   : > { %s793_s20 = scalar_lea.vmem %s792_s9, 512  ;;  %p794_p9 = scmp.lt.s32.totalorder %s1027_s7, %s792_s9 }
  0x2d   : > { %p789_p0 = pnand %p787_p10, %p1040_p1  ;;  %p795_p12 = scmp.lt.s32.totalorder %s793_s20, %s786_s28 }
  0x2f   : > { %p790_p2 = pneg %p789_p0  ;;  %p796_p11 = por %p795_p12, %p794_p9 }
  0x31   : > { %p797_p6 = pnand %p796_p11, %p790_p2 }
  0x33   : > { %800 = shalt.err (!%p797_p6)
}
  0x34   : > { %s1378_s17 = smov 128   ;;  %s1380_s30 = smov 8  }
  0x35   : > { %726 = dma.hbm_to_vmem [thread:$0]  (!%p1011_p13), %s1024_s5, 256, %s1027_s7, %s1034_s11, %s1378_s17, %s1378_s17, %s1380_s30  }
  0x36   : > { %p696_p9 = scmp.ge.s32.totalorder %s925_s15, 1  ;;  %p205_p11 = scmp.lt.s32.totalorder %s925_s15, 3 }
  0x37   : > { %s707_s6 = smul.u32 768, %s925_s15  ;;  %s148_s29 = scalar_lea.vmem [#allocation2], %s1017_s27 }
  0x38   : > { %p1068_p6 = pnand %p696_p9, %p205_p11  ;;  %s155_s28 = sshll.u32 %s148_s29, 4  ;;  %s1079_s28 = int_to_ptr.vmem [resolvable:$true] %s155_s28 }
  0x39   : > { %s1391_s0 = sld [smem:[#allocation12_spill]]  ;;  %s145_s5 = scalar_lea.sflag [#allocation3], %s144_s25 }
  0x3a   : > { %s1390_s4 = scalar_select %p1068_p6, 1, 0 }
  0x3f   : > { %s1077_s20 = scalar_lea.hbm %s1391_s0, %s707_s6  ;;  %s806_s29 = scalar_lea.hbm %s1391_s0, 1536 }
  0x40   : > { %s801_s7 = scalar_lea.hbm %s1077_s20, 256  ;;  %p807_p5 = scmp.lt.s32.totalorder %s1077_s20, %s1391_s0 }
  0x41   : > { %p802_p12 = scmp.ne.s32.totalorder %s1077_s20, %s801_s7  ;;  %p808_p7 = scmp.lt.s32.totalorder %s806_s29, %s801_s7 }
  0x43   : > { %p804_p3 = pnand %p802_p12, %p1040_p1  ;;  %p809_p8 = por %p808_p7, %p807_p5 }
  0x45   : > { %p805_p4 = pneg %p804_p3 }
  0x47   : > { %p810_p10 = pnand %p809_p8, %p805_p4 }
  0x49   : > { %813 = shalt.err (!%p810_p10)
}
  0x4a   : > { %s814_s25 = scalar_lea.vmem %s1079_s28, 256  ;;  %s930_s6 = smov [#allocation2]  }
  0x4b   : > { %p815_p0 = scmp.ne.s32.totalorder %s1079_s28, %s814_s25  ;;  %s819_s17 = sshll.u32 %s930_s6, 4  ;;  %s820_s17 = int_to_ptr.vmem [resolvable:$false] %s819_s17 }
  0x4c   : > { %s821_s30 = scalar_lea.vmem %s820_s17, 512  ;;  %p822_p11 = scmp.lt.s32.totalorder %s1079_s28, %s820_s17 }
  0x4d   : > { %p817_p2 = pnand %p815_p0, %p1040_p1  ;;  %p823_p12 = scmp.lt.s32.totalorder %s821_s30, %s814_s25 }
  0x4f   : > { %p818_p9 = pneg %p817_p2  ;;  %p824_p3 = por %p823_p12, %p822_p11 }
  0x51   : > { %p825_p6 = pnand %p824_p3, %p818_p9 }
  0x53   : > { %828 = shalt.err (!%p825_p6)
}
  0x54   : > { %s1392_s1 = smov 8   ;;  %s1393_s9 = smov 128  }
  0x55   : > { %723 = dma.hbm_to_vmem [thread:$0]  (!%p1011_p13), %s1077_s20, 256, %s1079_s28, %s145_s5, %s1393_s9, %s1393_s9, %s1392_s1  }
  0x56   : > { %s190_s7 = scalar_lea.vmem [#allocation7], %s1017_s27  ;;  %s829_s8 = scalar_lea.hbm %s1032_s10, 256 }
  0x57   : > { %s197_s29 = sshll.u32 %s190_s7, 4  ;;  %p830_p4 = scmp.ne.s32.totalorder %s1032_s10, %s829_s8  ;;  %s198_s29 = int_to_ptr.vmem [resolvable:$true] %s197_s29 }
  0x58   : > { %s834_s17 = scalar_lea.hbm %s1374_s2, 512  ;;  %p835_p7 = scmp.lt.s32.totalorder %s1032_s10, %s1374_s2 }
  0x59   : > { %p832_p6 = pnand %p830_p4, %p1040_p1  ;;  %p836_p8 = scmp.lt.s32.totalorder %s834_s17, %s829_s8 }
  0x5b   : > { %p833_p5 = pneg %p832_p6  ;;  %p837_p10 = por %p836_p8, %p835_p7 }
  0x5d   : > { %p838_p0 = pnand %p837_p10, %p833_p5 }
  0x5f   : > { %841 = shalt.err (!%p838_p0)
}
  0x60   : > { %s842_s27 = scalar_lea.vmem %s198_s29, 256  ;;  %s931_s28 = smov [#allocation7]  }
  0x61   : > { %p843_p2 = scmp.ne.s32.totalorder %s198_s29, %s842_s27  ;;  %s847_s20 = sshll.u32 %s931_s28, 4  ;;  %s848_s20 = int_to_ptr.vmem [resolvable:$false] %s847_s20 }
  0x62   : > { %s849_s5 = scalar_lea.vmem %s848_s20, 512  ;;  %p850_p12 = scmp.lt.s32.totalorder %s198_s29, %s848_s20 }
  0x63   : > { %p845_p9 = pnand %p843_p2, %p1040_p1  ;;  %p851_p3 = scmp.lt.s32.totalorder %s849_s5, %s842_s27 }
  0x65   : > { %p846_p11 = pneg %p845_p9  ;;  %p852_p4 = por %p851_p3, %p850_p12 }
  0x67   : > { %p853_p6 = pnand %p852_p4, %p846_p11 }
  0x69   : > { %856 = shalt.err (!%p853_p6)
}
  0x6a   : > { %729 = dma.hbm_to_vmem [thread:$0]  (!%p1011_p13), %s1032_s10, 256, %s198_s29, %s1034_s11, %s1393_s9, %s1393_s9, %s1392_s1  }
  0x6b   : > { %p1394_p1 = scmp.ne.s32.totalorder %s1390_s4, 0 }
  0x6c   : > { %s1130_s0 = sand.u32 (!%p1394_p1), 1, %s917_s13   ;;  %p1395_p5 = scmp.ne.s32.totalorder (!%p1394_p1), %s1384_s22, 0 }
  0x6d   : > { %209 = sbr.rel (%p1394_p1) target bundleno = 732 (0x2dc), region = 32  ;;  %s697_s19 = sshll.u32 (!%p1394_p1), %s1130_s0, 4 }
  0x6e   : > { %s212_s7 = scalar_lea.sflag (!%p1394_p1), [#allocation3], %s1130_s0  ;;  %s215_s8 = scalar_lea.vmem (!%p1394_p1), [#allocation2], %s697_s19 }
  0x72   : > { %900 = dma.done.wait (%p1395_p5), %s212_s7, 256  }
  0x73   : > { %902 = vsyncadd (%p1395_p5), %s212_s7, 4294967040  ;;  %s220_s26 = sand.u32 1, %s977_s16   ;;  %s224_s11 = scalar_lea.vmem [#allocation5], %s697_s19 }
  0x74   : > { %s221_s10 = scalar_lea.sflag [#allocation6], %s220_s26 }
  0x75   : > { %904 = dma.done.wait (%p1395_p5), %s221_s10, 512  }
  0x76   : > { %906 = vsyncadd (%p1395_p5), %s221_s10, 4294966784  ;;  %v1143_v0 = vld [vmem:[%s215_s8] sm:$0xff]  ;;  %s932_s4 = smov 16   ;;  %v1149_v2 = vld [vmem:[%s215_s8 + $0x8] sm:$0xff]  ;;  %s233_s1 = scalar_lea.vmem [#allocation7], %s697_s19  ;;  %vm302_vm0 = vcmask 1047680   ;;  %v272_v39 = vlaneseq }
  0x77   : > { %v1145_v1 = vld [vmem:[%s224_s11] sm:$0xff]  ;;  %303 = vrot.lane.b32.xlu0 %v1143_v0, %s932_s4  ;;  %v1151_v3 = vld [vmem:[%s224_s11 + $0x8] sm:$0xff]  ;;  %s933_s22 = smov 113   ;;  %s934_s9 = smov 127   ;;  %vm289_vm1 = vcmask 130048   ;;  %v335_v42 = vmul.f32 2.0, %v1143_v0 }
  0x78   : > { %381 = vrot.lane.b32.xlu1 %v1145_v1, %s932_s4  ;;  %v1155_v4 = vld [vmem:[%s233_s1] sm:$0xff]  ;;  %v1157_v5 = vld [vmem:[%s233_s1 + $0x8] sm:$0xff]  ;;  %v283_v30 = vmax.f32 %v1143_v0, %v1145_v1  ;;  %v284_v31 = vmax.f32 %v1149_v2, %v1151_v3  ;;  %v1193_v40 = vand.u32 127, %v272_v39  ;;  %v336_v43 = vmul.f32 2.0, %v1149_v2  ;;  %s700_s29 = sshll.u32 %s1130_s0, 3  ;;  %s702_s25 = sshll.u32 %s977_s16, 7 }
  0x79   : > { %v1199_v46 = vshrl.u32 %v272_v39, 7  ;;  %v413_v62 = vmul.f32 2.0, %v1145_v1  ;;  %s265_s17 = scalar_lea.vmem [#allocation8], %s700_s29  ;;  %s1335_s5 = scalar_lea.hbm %s1375_s3, %s702_s25 }
  0x7a   : > { %v285_v32 = vsub.f32 %v283_v30, %v1155_v4  ;;  %v286_v33 = vsub.f32 %v284_v31, %v1157_v5  ;;  %vm277_vm2 = vcmp.gt.s32.totalorder %v1193_v40, 0  ;;  %vm278_vm3 = vcmp.lt.s32.totalorder %v1193_v40, 15  ;;  %s572_s30 = sshll.u32 %s265_s17, 4  ;;  %s559_s16 = scalar_lea.sflag [#allocation4], %s1130_s0  ;;  %s573_s30 = int_to_ptr.vmem [resolvable:$true] %s572_s30 }
  0x7b   : > { %306 = vrot.lane.b32.xlu0 %v1149_v2, %s932_s4  ;;  %vm343_vm4 = vcmp.lt.s32.totalorder %v1199_v46, 1  ;;  %v1209_v55 = vadd.s32 8, %v1199_v46  ;;  %vm354_vm5 = vcmp.lt.s32.totalorder %v1199_v46, 7  ;;  %vm279_vm6 = vcmp.gt.s32.totalorder %v1199_v46, 0  ;;  %s857_s19 = scalar_lea.vmem %s573_s30, 128  ;;  %p1396_p7 = scmp.ne.s32.totalorder %s1385_s23, 0 }
  0x7c   : > { %384 = vrot.lane.b32.xlu1 %v1151_v3, %s932_s4  ;;  %v287_v34 = vand.u32 2147483647, %v285_v32  ;;  %v288_v35 = vand.u32 2147483647, %v286_v33  ;;  %vm552_vm8 = vcmp.eq.s32.totalorder %v1199_v46, 1  ;;  %vm551_vm9 = vcmp.eq.s32.totalorder %v1199_v46, 0  ;;  %p858_p13 = scmp.ne.s32.totalorder %s573_s30, %s857_s19 }
  0x7d   : > { %vm282_vm7 = vcmp.lt.s32.totalorder %v1209_v55, 15  ;;  %s935_s7 = smov [#allocation8]  }
  0x7e   : > { %v290_v36 = vsel %vm289_vm1, %v287_v34, 0.0  ;;  %v291_v37 = vsel %vm289_vm1, %v288_v35, 0.0  ;;  %p859_p8 = pnand %p858_p13, %p1396_p7  ;;  %s861_s8 = sshll.u32 %s935_s7, 4  ;;  %s862_s8 = int_to_ptr.vmem [resolvable:$false] %s861_s8 }
  0x7f   : > { %459 = vrot.lane.b32.xlu0 %v1155_v4, %s932_s4  ;;  %v292_v38 = vadd.f32 %v291_v37, %v290_v36  ;;  %s863_s26 = scalar_lea.vmem %s862_s8, 256  ;;  %p864_p0 = scmp.lt.s32.totalorder %s573_s30, %s862_s8 }
  0x80   : > { %462 = vrot.lane.b32.xlu1 %v1157_v5, %s932_s4  ;;  %p860_p10 = pneg %p859_p8  ;;  %p865_p2 = scmp.lt.s32.totalorder %s863_s26, %s857_s19 }
  0x82   : > { %p866_p9 = por %p865_p2, %p864_p0 }
  0x84   : > { %p867_p11 = pnand %p866_p9, %p860_p10 }
  0xe9   : > { %v304_v6 = vpop.permute.xlu0 %303 }
  0xea   : > { %v382_v7 = vpop.permute.xlu1 %381  ;;  %v305_v8 = vsel %vm302_vm0, %v304_v6, %v1143_v0 }
  0xeb   : > { %309 = vrot.lane.b32.xlu0 %v305_v8, %s932_s4  ;;  %v383_v9 = vsel %vm302_vm0, %v382_v7, %v1145_v1 }
  0xed   : > { %v307_v10 = vpop.permute.xlu0 %306 }
  0xee   : > { %v385_v11 = vpop.permute.xlu1 %384  ;;  %v308_v12 = vsel %vm302_vm0, %v307_v10, %v1149_v2 }
  0xef   : > { %311 = vrot.lane.b32.xlu1 %v308_v12, %s932_s4  ;;  %387 = vrot.lane.b32.xlu0 %v383_v9, %s932_s4  ;;  %v386_v13 = vsel %vm302_vm0, %v385_v11, %v1151_v3  ;;  %v414_v11 = vmul.f32 2.0, %v1151_v3 }
  0xf1   : > { %v460_v14 = vpop.permute.xlu0 %459 }
  0xf2   : > { %v463_v15 = vpop.permute.xlu1 %462  ;;  %v461_v16 = vsel %vm302_vm0, %v460_v14, %v1155_v4 }
  0xf3   : > { %389 = vrot.lane.b32.xlu1 %v386_v13, %s932_s4  ;;  %465 = vrot.lane.b32.xlu0 %v461_v16, %s932_s4  ;;  %v464_v17 = vsel %vm302_vm0, %v463_v15, %v1157_v5 }
  0xf7   : > { %467 = vrot.lane.b32.xlu1 %v464_v17, %s932_s4  ;;  %v491_v17 = vmul.f32 2.0, %v1155_v4 }
 0x15d   : > { %v310_v18 = vpop.permute.xlu0 %309 }
 0x15e   : > { %v313_v19 = vsel %vm302_vm0, %v310_v18, %v1143_v0  ;;  %v492_v18 = vmul.f32 2.0, %v1157_v5 }
 0x15f   : > { %317 = vrot.lane.b32.xlu0 %v313_v19, %s933_s22 }
 0x161   : > { %v312_v20 = vpop.permute.xlu1 %311  ;;  %v388_v21 = vpop.permute.xlu0 %387 }
 0x162   : > { %v314_v22 = vsel %vm302_vm0, %v312_v20, %v1149_v2  ;;  %v391_v23 = vsel %vm302_vm0, %v388_v21, %v1145_v1 }
 0x163   : > { %319 = vrot.lane.b32.xlu1 %v314_v22, %s933_s22  ;;  %325 = vrot.lane.b32.xlu0 %v313_v19, %s934_s9 }
 0x165   : > { %v390_v24 = vpop.permute.xlu1 %389  ;;  %v466_v26 = vpop.permute.xlu0 %465 }
 0x166   : > { %v392_v25 = vsel %vm302_vm0, %v390_v24, %v1151_v3  ;;  %v469_v27 = vsel %vm302_vm0, %v466_v26, %v1155_v4 }
 0x167   : > { %327 = vrot.lane.b32.xlu1 %v314_v22, %s934_s9  ;;  %395 = vrot.lane.b32.xlu0 %v391_v23, %s933_s22 }
 0x169   : > { %v468_v28 = vpop.permute.xlu1 %467 }
 0x16a   : > { %v470_v29 = vsel %vm302_vm0, %v468_v28, %v1157_v5 }
 0x16b   : > { %397 = vrot.lane.b32.xlu1 %v392_v25, %s933_s22  ;;  %403 = vrot.lane.b32.xlu0 %v391_v23, %s934_s9 }
 0x16f   : > { %405 = vrot.lane.b32.xlu1 %v392_v25, %s934_s9  ;;  %473 = vrot.lane.b32.xlu0 %v469_v27, %s933_s22 }
 0x173   : > { %475 = vrot.lane.b32.xlu1 %v470_v29, %s933_s22  ;;  %481 = vrot.lane.b32.xlu0 %v469_v27, %s934_s9 }
 0x177   : > { %483 = vrot.lane.b32.xlu1 %v470_v29, %s934_s9 }
 0x192   : > { %293 = vadd.xlane.f32.xlu0 %v292_v38 }
 0x1d1   : > { %v318_v41 = vpop.permute.xlu0 %317 }
 0x1d2   : > { %v323_v47 = vsel %vm277_vm2, %v318_v41, 0.0 }
 0x1d3   : > { %v337_v51 = vadd.f32 %v335_v42, %v323_v47 }
 0x1d5   : > { %v320_v44 = vpop.permute.xlu1 %319  ;;  %v326_v45 = vpop.permute.xlu0 %325 }
 0x1d6   : > { %v324_v48 = vsel %vm277_vm2, %v320_v44, 0.0  ;;  %v331_v49 = vsel %vm278_vm3, %v326_v45, 0.0 }
 0x1d7   : > { %v333_v50 = vsub.f32 %v331_v49, %v323_v47  ;;  %v338_v52 = vadd.f32 %v336_v43, %v324_v48  ;;  %v339_v57 = vadd.f32 %v337_v51, %v331_v49 }
 0x1d9   : > { %v328_v53 = vpop.permute.xlu1 %327  ;;  %v396_v54 = vpop.permute.xlu0 %395  ;;  %v341_v60 = vrot.slane %v333_v50, 7  ;;  %v352_v61 = vrot.slane %v333_v50, 1  ;;  %v361_v12 = vrot.slane %v339_v57, 7  ;;  %v367_v15 = vrot.slane %v339_v57, 1 }
 0x1da   : > { %v332_v56 = vsel %vm278_vm3, %v328_v53, 0.0  ;;  %v401_v10 = vsel %vm277_vm2, %v396_v54, 0.0  ;;  %v348_v19 = vmul.f32 2.0, %v333_v50 }
 0x1db   : > { %v334_v58 = vsub.f32 %v332_v56, %v324_v48  ;;  %v340_v59 = vadd.f32 %v338_v52, %v332_v56  ;;  %v415_v21 = vadd.f32 %v413_v62, %v401_v10 }
 0x1dd   : > { %v342_v63 = vrot.slane %v334_v58, 7  ;;  %v349_v0 = vmul.f32 2.0, %v334_v58  ;;  %v353_v2 = vrot.slane %v334_v58, 1  ;;  %v362_v6 = vrot.slane %v340_v59, 7  ;;  %v398_v7 = vpop.permute.xlu1 %397  ;;  %v404_v8 = vpop.permute.xlu0 %403 }
 0x1de   : > { %v368_v9 = vrot.slane %v340_v59, 1  ;;  %v409_v16 = vsel %vm278_vm3, %v404_v8, 0.0  ;;  %v402_v4 = vsel %vm277_vm2, %v398_v7, 0.0 }
 0x1df   : > { %v344_v13 = vsel %vm343_vm4, %v341_v60, %v342_v63  ;;  %v345_v1 = vsel %vm343_vm4, %v342_v63, %v341_v60  ;;  %v356_v14 = vsel %vm354_vm5, %v353_v2, %v352_v61  ;;  %v364_v20 = vsel %vm343_vm4, %v362_v6, %v361_v12 }
 0x1e0   : > { %v351_v3 = vadd.f32 %v349_v0, %v344_v13  ;;  %v346_v24 = vsel %vm279_vm6, %v345_v1, 0.0  ;;  %v358_v25 = vsel %vm282_vm7, %v356_v14, 0.0  ;;  %v370_v26 = vsel %vm354_vm5, %v368_v9, %v367_v15 }
 0x1e1   : > { %v406_v22 = vpop.permute.xlu1 %405  ;;  %v474_v23 = vpop.permute.xlu0 %473  ;;  %v355_v5 = vsel %vm354_vm5, %v352_v61, %v353_v2  ;;  %v1244_v27 = vsel %vm279_vm6, %v364_v20, 0.0  ;;  %v1248_v28 = vsel %vm354_vm5, %v367_v15, %v368_v9  ;;  %v411_v29 = vsub.f32 %v409_v16, %v401_v10 }
 0x1e2   : > { %v1252_v30 = vsel %vm343_vm4, %v361_v12, %v362_v6  ;;  %v417_v31 = vadd.f32 %v415_v21, %v409_v16  ;;  %v410_v32 = vsel %vm278_vm3, %v406_v22, 0.0  ;;  %v479_v33 = vsel %vm277_vm2, %v474_v23, 0.0 }
 0x1e3   : > { %v350_v34 = vadd.f32 %v348_v19, %v346_v24  ;;  %v1258_v35 = vadd.f32 %v358_v25, %v351_v3  ;;  %v1262_v36 = vsel %vm282_vm7, %v370_v26, 0.0  ;;  %v416_v37 = vadd.f32 %v414_v11, %v402_v4 }
 0x1e4   : > { %v373_v39 = vsub.f32 %v1244_v27, %v1248_v28  ;;  %v419_v41 = vrot.slane %v411_v29, 7  ;;  %v425_v42 = vmul.f32 2.0, %v411_v29  ;;  %v412_v43 = vsub.f32 %v410_v32, %v402_v4 }
 0x1e5   : > { %v482_v38 = vpop.permute.xlu0 %481  ;;  %v476_v44 = vpop.permute.xlu1 %475  ;;  %v429_v45 = vrot.slane %v411_v29, 1  ;;  %v418_v47 = vadd.f32 %v416_v37, %v410_v32  ;;  %v493_v48 = vadd.f32 %v491_v17, %v479_v33  ;;  %v437_v50 = vrot.slane %v417_v31, 7 }
 0x1e6   : > { %v487_v49 = vsel %vm278_vm3, %v482_v38, 0.0  ;;  %v420_v51 = vrot.slane %v412_v43, 7  ;;  %v426_v52 = vmul.f32 2.0, %v412_v43  ;;  %v430_v53 = vrot.slane %v412_v43, 1 }
 0x1e7   : > { %v443_v54 = vrot.slane %v417_v31, 1  ;;  %v438_v56 = vrot.slane %v418_v47, 7  ;;  %v444_v57 = vrot.slane %v418_v47, 1  ;;  %v480_v58 = vsel %vm277_vm2, %v476_v44, 0.0 }
 0x1e8   : > { %v421_v59 = vsel %vm343_vm4, %v419_v41, %v420_v51  ;;  %v422_v60 = vsel %vm343_vm4, %v420_v51, %v419_v41  ;;  %v432_v61 = vsel %vm354_vm5, %v430_v53, %v429_v45  ;;  %v489_v62 = vsub.f32 %v487_v49, %v479_v33 }
 0x1e9   : > { %v423_v63 = vsel %vm279_vm6, %v422_v60, 0.0  ;;  %v428_v0 = vadd.f32 %v426_v52, %v421_v59  ;;  %v434_v2 = vsel %vm282_vm7, %v432_v61, 0.0  ;;  %v495_v6 = vadd.f32 %v493_v48, %v487_v49  ;;  %v484_v11 = vpop.permute.xlu1 %483 }
 0x1ea   : > { %v427_v7 = vadd.f32 %v425_v42, %v423_v63  ;;  %v439_v8 = vsel %vm343_vm4, %v437_v50, %v438_v56  ;;  %v440_v9 = vsel %vm343_vm4, %v438_v56, %v437_v50  ;;  %v446_v10 = vsel %vm354_vm5, %v444_v57, %v443_v54 }
 0x1eb   : > { %v436_v12 = vadd.f32 %v434_v2, %v428_v0  ;;  %v441_v13 = vsel %vm279_vm6, %v440_v9, 0.0  ;;  %v445_v1 = vsel %vm354_vm5, %v443_v54, %v444_v57  ;;  %v448_v14 = vsel %vm282_vm7, %v446_v10, 0.0 }
 0x1ec   : > { %v374_v15 = vsub.f32 %v1252_v30, %v1262_v36  ;;  %v376_v16 = vand.u32 2147483647, %v1258_v35  ;;  %v494_v17 = vadd.f32 %v492_v18, %v480_v58  ;;  %v359_v19 = vadd.f32 %v355_v5, %v350_v34 }
 0x1ed   : > { %v431_v3 = vsel %vm354_vm5, %v429_v45, %v430_v53  ;;  %v450_v20 = vsub.f32 %v439_v8, %v448_v14  ;;  %v497_v21 = vrot.slane %v489_v62, 7  ;;  %v488_v22 = vsel %vm278_vm3, %v484_v11, 0.0 }
 0x1ee   : > { %v449_v23 = vsub.f32 %v441_v13, %v445_v1  ;;  %v503_v24 = vmul.f32 2.0, %v489_v62  ;;  %v490_v25 = vsub.f32 %v488_v22, %v480_v58  ;;  %v496_v26 = vadd.f32 %v494_v17, %v488_v22 }
 0x1ef   : > { %v452_v4 = vand.u32 2147483647, %v436_v12  ;;  %v507_v29 = vrot.slane %v489_v62, 1  ;;  %v515_v31 = vrot.slane %v495_v6, 7  ;;  %v435_v30 = vadd.f32 %v431_v3, %v427_v7 }
 0x1f0   : > { %v498_v32 = vrot.slane %v490_v25, 7  ;;  %v504_v33 = vmul.f32 2.0, %v490_v25  ;;  %v508_v18 = vrot.slane %v490_v25, 1  ;;  %v516_v5 = vrot.slane %v496_v26, 7 }
 0x1f1   : > { %v454_v34 = vand.u32 2147483647, %v450_v20  ;;  %v521_v35 = vrot.slane %v495_v6, 1  ;;  %v522_v36 = vrot.slane %v496_v26, 1  ;;  %v451_v37 = vand.u32 2147483647, %v435_v30 }
 0x1f2   : > { %v499_v40 = vsel %vm343_vm4, %v497_v21, %v498_v32  ;;  %v500_v38 = vsel %vm343_vm4, %v498_v32, %v497_v21  ;;  %v510_v41 = vsel %vm354_vm5, %v508_v18, %v507_v29  ;;  %v517_v42 = vsel %vm343_vm4, %v515_v31, %v516_v5 }
 0x1f3   : > { %v501_v43 = vsel %vm279_vm6, %v500_v38, 0.0  ;;  %v506_v44 = vadd.f32 %v504_v33, %v499_v40  ;;  %v518_v45 = vsel %vm343_vm4, %v516_v5, %v515_v31  ;;  %v523_v47 = vsel %vm354_vm5, %v521_v35, %v522_v36 }
 0x1f4   : > { %v378_v48 = vand.u32 2147483647, %v374_v15  ;;  %v453_v49 = vand.u32 2147483647, %v449_v23  ;;  %v519_v50 = vsel %vm279_vm6, %v518_v45, 0.0  ;;  %v524_v51 = vsel %vm354_vm5, %v522_v36, %v521_v35 }
 0x1f5   : > { %v526_v52 = vsel %vm282_vm7, %v524_v51, 0.0  ;;  %v527_v53 = vsub.f32 %v519_v50, %v523_v47  ;;  %v375_v54 = vand.u32 2147483647, %v359_v19  ;;  %v505_v56 = vadd.f32 %v503_v24, %v501_v43 }
 0x1f6   : > { %v377_v57 = vand.u32 2147483647, %v373_v39  ;;  %v528_v58 = vsub.f32 %v517_v42, %v526_v52  ;;  %v509_v59 = vsel %vm354_vm5, %v507_v29, %v508_v18  ;;  %v512_v60 = vsel %vm282_vm7, %v510_v41, 0.0 }
 0x1f7   : > { %v455_v61 = vadd.f32 %v453_v49, %v451_v37  ;;  %v456_v62 = vadd.f32 %v454_v34, %v452_v4  ;;  %v513_v63 = vadd.f32 %v509_v59, %v505_v56  ;;  %v514_v0 = vadd.f32 %v512_v60, %v506_v44 }
 0x1f8   : > { %v380_v2 = vadd.f32 %v378_v48, %v376_v16  ;;  %v532_v6 = vand.u32 2147483647, %v528_v58  ;;  %v379_v7 = vadd.f32 %v377_v57, %v375_v54  ;;  %v531_v10 = vand.u32 2147483647, %v527_v53 }
 0x1f9   : > { %v529_v8 = vand.u32 2147483647, %v513_v63  ;;  %v530_v9 = vand.u32 2147483647, %v514_v0 }
 0x1fa   : > { %v457_v11 = vmax.f32 %v379_v7, %v455_v61  ;;  %v458_v27 = vmax.f32 %v380_v2, %v456_v62 }
 0x1fb   : > { %v533_v28 = vadd.f32 %v531_v10, %v529_v8  ;;  %v534_v39 = vadd.f32 %v532_v6, %v530_v9 }
 0x1fd   : > { %v535_v12 = vsub.f32 %v457_v11, %v533_v28  ;;  %v536_v13 = vsub.f32 %v458_v27, %v534_v39 }
 0x1ff   : > { %v537_v1 = vand.u32 2147483647, %v535_v12  ;;  %v538_v14 = vand.u32 2147483647, %v536_v13 }
 0x201   : > { %v539_v55 = vsel %vm289_vm1, %v537_v1, 0.0  ;;  %v540_v15 = vsel %vm289_vm1, %v538_v14, 0.0 }
 0x202   : > { %v541_v17 = vadd.f32 %v540_v15, %v539_v55 }
 0x204   : > { %542 = vadd.xlane.f32.xlu1 %v541_v17 }
 0x21b   : > { %v294_v16 = vpop.xlane.xlu0 %293 }
 0x21c   : > { %v295_v19 = vrot.slane %v294_v16, 4 }
 0x21e   : > { %v296_v3 = vadd.f32 %v295_v19, %v294_v16 }
 0x220   : > { %v297_v20 = vrot.slane %v296_v3, 2 }
 0x222   : > { %v298_v21 = vadd.f32 %v297_v20, %v296_v3 }
 0x224   : > { %v299_v22 = vrot.slane %v298_v21, 1 }
 0x226   : > { %v300_v23 = vadd.f32 %v299_v22, %v298_v21 }
 0x228   : > { %708 = vpush %v300_v23 }
 0x259   : > { %s709_s6 = spop %708 }
 0x25a   : > { %v555_v33 = vstv %s709_s6 }
 0x28d   : > { %v543_v24 = vpop.xlane.xlu1 %542 }
 0x28e   : > { %v544_v25 = vrot.slane %v543_v24, 4 }
 0x290   : > { %v545_v26 = vadd.f32 %v544_v25, %v543_v24 }
 0x292   : > { %v546_v4 = vrot.slane %v545_v26, 2 }
 0x294   : > { %v547_v29 = vadd.f32 %v546_v4, %v545_v26 }
 0x296   : > { %v548_v31 = vrot.slane %v547_v29, 1 }
 0x298   : > { %v549_v30 = vadd.f32 %v548_v31, %v547_v29 }
 0x29a   : > { %710 = vpush %v549_v30 }
 0x2cb   : > { %s711_s27 = spop %710 }
 0x2cc   : > { %v553_v32 = vstv %s711_s27 }
 0x2cd   : > { %v554_v18 = vsel %vm552_vm8, %v553_v32, 0.0 }
 0x2ce   : > { %v556_v5 = vsel %vm551_vm9, %v555_v33, %v554_v18 }
 0x2cf   : > { %557 = vst [vmem:[%s265_s17] sm:$0xff] %v556_v5 }
 0x2d0   : > { %870 = shalt.err (!%p867_p11)
}
 0x2d1   : > { %s871_s10 = scalar_lea.hbm %s1335_s5, 128  ;;  %s875_s4 = scalar_lea.hbm %s1375_s3, 256 }
 0x2d2   : > { %p872_p12 = scmp.ne.s32.totalorder %s1335_s5, %s871_s10  ;;  %p876_p6 = scmp.lt.s32.totalorder %s1335_s5, %s1375_s3 }
 0x2d3   : > { %p877_p1 = scmp.lt.s32.totalorder %s875_s4, %s871_s10 }
 0x2d4   : > { %p873_p3 = pnand %p872_p12, %p1396_p7 }
 0x2d5   : > { %p878_p5 = por %p877_p1, %p876_p6 }
 0x2d6   : > { %p874_p4 = pneg %p873_p3 }
 0x2d8   : > { %p879_p13 = pnand %p878_p5, %p874_p4 }
 0x2da   : > { %882 = shalt.err (!%p879_p13)
}
 0x2db   : > { %718 = dma.vmem_to_hbm [thread:$0]  (%p1396_p7), %s573_s30, 128, %s1335_s5, %s559_s16  }
 0x2dc PF: > { %s584_s9 = sand.u32 1, %s913_s12   ;;  %p1397_p8 = scmp.ne.s32.totalorder %s1386_s24, 0 }
 0x2dd   : > { %p1398_p10 = scmp.ge.s32.totalorder %s925_s15, 2  ;;  %s585_s29 = scalar_lea.sflag [#allocation4], %s584_s9 }
 0x2df   : > { %p731_p0 = pnand %p1398_p10, %p1397_p8 }
 0x2e1   : > { %p732_p2 = pneg %p731_p0 }
 0x2e3   : > { %908 = dma.done.wait (%p732_p2), %s585_s29, 128  }
 0x2e4   : > { %910 = vsyncadd (%p732_p2), %s585_s29, 4294967168  ;;  %p19_p9 = scmp.ge.s32.totalorder %s981_s18, 4   ;;  %s1399_s12 = smov %s917_s13 }
 0x2e5   : > { %s1400_s13 = smov %s921_s14  ;;  %s1401_s14 = smov %s993_s21 }
 0x2e6   : > { %s1402_s15 = smov %s981_s18  ;;  %21 = sbr.rel (!%p19_p9) target bundleno = 10 (0xa), region = 101 }
 0x2eb   :  { %590 = vsyncpa [#allocation3], 1 }
 0x2ec   :  { %592 = vsyncpa [#allocation3 + $0x1], 1 }
 0x2ed   :  { %593 = vsyncpa [#allocation6], 1 }
 0x2ee   :  { %595 = vsyncpa [#allocation6 + $0x1], 1 }
 0x2ef   :  { %596 = vsyncpa [#allocation4], 1 }
 0x2f0   :  { %598 = vsyncpa [#allocation4 + $0x1], 1 }

</bundles_post_ra>
